<compile_context>
chip_gen: v6e
topology: v6e:2x2x1
jax: 0.10.0
libtpu: 0.0.40
codegen_flags: <defaults>
</compile_context>

<pallas_src>
import jax
import jax.numpy as jnp
from jax import lax
from jax.experimental import pallas as pl
from jax.experimental.pallas import tpu as pltpu


def mlp_kernel(x_ref, w0_ref, b0_ref, w1_ref, b1_ref, w2_ref, b2_ref, ot_ref):
    # Batch-in-lanes compute: contract over the feature axis of BOTH operands so
    # activations come out as [features_out, batch_tile] (batch on the 128-lane
    # axis) without any wrapper-side transpose of x.
    x = x_ref[...]                                                    # [tb, D]

    # dense_0 + relu:  einsum('od,bd->ob', W0, x)  -> [5, tb], f32 accumulation
    h0 = lax.dot_general(
        w0_ref[...], x,
        dimension_numbers=(((1,), (1,)), ((), ())),
        preferred_element_type=jnp.float32)
    h0 = jnp.maximum(h0 + b0_ref[...], 0.0)                           # [5, tb] f32

    # dense_1 + relu  (intermediate activations kept f32 for accuracy; K=5 is free)
    h1 = jnp.dot(w1_ref[...].astype(jnp.float32), h0,
                 preferred_element_type=jnp.float32)
    h1 = jnp.maximum(h1 + b1_ref[...], 0.0)                           # [5, tb] f32

    # out (no activation)
    y = jnp.dot(w2_ref[...].astype(jnp.float32), h1,
                preferred_element_type=jnp.float32) + b2_ref[...]
    ot_ref[...] = y.astype(ot_ref.dtype)                              # [out, tb]


def pytorch_model_forward(x, params, *, block_b=32768, compute_dtype=jnp.bfloat16):
    """x: [B, input_dim].  params use PyTorch-native shapes:
         w0 [5, input_dim], b0 [5, 1], w1 [5, 5], b1 [5, 1], w2 [out, 5], b2 [out, 1].
    Returns [B, output_dim] float32.
    """
    B, D = x.shape
    out_dim = params["w2"].shape[0]
    itemsize = jnp.dtype(compute_dtype).itemsize

    # Casts only — no transpose, no pad (both were extra HBM passes over x).
    x_c = x.astype(compute_dtype)                                     # [B, D]
    w0 = params["w0"].astype(compute_dtype)
    w1 = params["w1"].astype(compute_dtype)
    w2 = params["w2"].astype(compute_dtype)
    b0 = params["b0"].astype(jnp.float32)
    b1 = params["b1"].astype(jnp.float32)
    b2 = params["b2"].astype(jnp.float32)

    # Batch tile.  Budget the two double-buffered streaming blocks (x in, y out)
    # well under v5e's 16 MiB scoped-VMEM default; on v6e/v7x there is more slack.
    vmem_budget = 12 * 1024 * 1024
    row_bytes = D * itemsize + out_dim * 4
    tb_cap = max(128, (vmem_budget // (2 * row_bytes)) // 128 * 128)

    if B <= 128:
        tb = B                                   # single (possibly ragged) block
    else:
        # >= 2 grid steps when possible so the "parallel" batch axis can shard
        # across v7x's two TensorCores; keep the tile a multiple of 128 lanes.
        half = ((pl.cdiv(B, 2) + 127) // 128) * 128
        tb = max(128, min(block_b, tb_cap, half))
    grid = (pl.cdiv(B, tb),)                      # ragged tail handled by Pallas

    # Constant index_map -> fetched once, stays VMEM-resident across the batch grid.
    const = lambda arr: pl.BlockSpec(arr.shape, lambda i: (0,) * arr.ndim)

    cost = pl.CostEstimate(
        flops=2 * B * (5 * D + 5 * 5 + 5 * out_dim),
        transcendentals=0,
        bytes_accessed=(B * D * itemsize + B * out_dim * 4
                        + (w0.size + w1.size + w2.size) * itemsize
                        + (b0.size + b1.size + b2.size) * 4),
    )

    yt = pl.pallas_call(
        mlp_kernel,
        out_shape=jax.ShapeDtypeStruct((out_dim, B), jnp.float32),
        grid=grid,
        in_specs=[
            pl.BlockSpec((tb, D), lambda i: (i, 0)),   # x streams over the batch
            const(w0), const(b0),
            const(w1), const(b1),
            const(w2), const(b2),
        ],
        # Batch on the lane axis -> lane-dense, unmasked stores.
        out_specs=pl.BlockSpec((out_dim, tb), lambda i: (0, i)),
        compiler_params=pltpu.CompilerParams(
            # Independent batch axis: shards across the two TCs on v7x
            # (measured no-op on single-TC v5e/v6e, kept for portability).
            dimension_semantics=("parallel",),
        ),
        cost_estimate=cost,
    )(x_c, w0, b0, w1, b1, w2, b2)

    return yt.T                                                       # [B, out_dim]


def init_params(key, input_dim, output_dim):
    """Deterministic init mimicking nn.Linear default: U(-1/sqrt(fan_in), ...).
    PyTorch-native shapes: W [out, in], b [out, 1]."""
    ks = jax.random.split(key, 6)

    def linear(kw, kb, fan_in, fan_out):
        bound = 1.0 / jnp.sqrt(jnp.float32(fan_in))
        w = jax.random.uniform(kw, (fan_out, fan_in), jnp.float32, -bound, bound)
        b = jax.random.uniform(kb, (fan_out, 1), jnp.float32, -bound, bound)
        return w, b

    w0, b0 = linear(ks[0], ks[1], input_dim, 5)
    w1, b1 = linear(ks[2], ks[3], 5, 5)
    w2, b2 = linear(ks[4], ks[5], 5, output_dim)
    return {"w0": w0, "b0": b0, "w1": w1, "b1": b1, "w2": w2, "b2": b2}


def reference_forward(x, p):
    h0 = jnp.maximum(x @ p["w0"].T + p["b0"].T, 0.0)
    h1 = jnp.maximum(h0 @ p["w1"].T + p["b1"].T, 0.0)
    return h1 @ p["w2"].T + p["b2"].T


if __name__ == "__main__":
    key = jax.random.PRNGKey(0)
    kx, kp = jax.random.split(key)

    batch, input_dim, output_dim = 8, 32, 3
    x = jax.random.normal(kx, (batch, input_dim), jnp.float32)
    params = init_params(kp, input_dim, output_dim)
    y_ref = reference_forward(x, params)

    # f32 path (tiny batch -> single block, grid=(1,))
    y = jax.block_until_ready(
        pytorch_model_forward(x, params, compute_dtype=jnp.float32))
    assert y.shape == (batch, output_dim)
    assert jnp.allclose(y, y_ref, atol=1e-4, rtol=1e-4)

    # default bf16 x/weight path (f32 accumulation and f32 intermediates)
    y_bf16 = jax.block_until_ready(pytorch_model_forward(x, params))
    assert y_bf16.shape == (batch, output_dim)
    assert jnp.allclose(y_bf16, y_ref, atol=5e-2, rtol=5e-2)

    # multi-tile path with ragged last block (no pad, no wrapper transpose of x)
    big_batch = 2048 + 7
    xb = jax.random.normal(kx, (big_batch, input_dim), jnp.float32)
    yb = jax.block_until_ready(
        pytorch_model_forward(xb, params, compute_dtype=jnp.float32))
    assert yb.shape == (big_batch, output_dim)
    assert jnp.allclose(yb, reference_forward(xb, params), atol=1e-4, rtol=1e-4)

    print("KERNEL_OK")
</pallas_src>

<mosaic_0001>
module attributes {stable_mosaic.version = 11 : i64} {
  func.func @mlp_kernel(%arg0: i32, %arg1: memref<8x32xf32, #tpu.memory_space<vmem>>, %arg2: memref<5x32xf32, #tpu.memory_space<vmem>>, %arg3: memref<5x1xf32, #tpu.memory_space<vmem>>, %arg4: memref<5x5xf32, #tpu.memory_space<vmem>>, %arg5: memref<5x1xf32, #tpu.memory_space<vmem>>, %arg6: memref<3x5xf32, #tpu.memory_space<vmem>>, %arg7: memref<3x1xf32, #tpu.memory_space<vmem>>, %arg8: memref<3x8xf32, #tpu.memory_space<vmem>>) attributes {dimension_semantics = [#tpu.dimension_semantics<parallel>], iteration_bounds = array<i64: 1>, scalar_prefetch = 0 : i64, scratch_operands = 0 : i64, tpu.core_type = #tpu.core_type<tc>, window_params = [{transform_indices = @transform_0, window_bounds = array<i64: 8, 32>}, {pipeline_mode = #tpu.pipeline_mode<synchronous>, transform_indices = @transform_1, window_bounds = array<i64: 5, 32>}, {pipeline_mode = #tpu.pipeline_mode<synchronous>, transform_indices = @transform_2, window_bounds = array<i64: 5, 1>}, {pipeline_mode = #tpu.pipeline_mode<synchronous>, transform_indices = @transform_3, window_bounds = array<i64: 5, 5>}, {pipeline_mode = #tpu.pipeline_mode<synchronous>, transform_indices = @transform_4, window_bounds = array<i64: 5, 1>}, {pipeline_mode = #tpu.pipeline_mode<synchronous>, transform_indices = @transform_5, window_bounds = array<i64: 3, 5>}, {pipeline_mode = #tpu.pipeline_mode<synchronous>, transform_indices = @transform_6, window_bounds = array<i64: 3, 1>}, {transform_indices = @transform_7, window_bounds = array<i64: 3, 8>}]} {
    %c0 = arith.constant 0 : index
    %c0_0 = arith.constant 0 : index
    %0 = vector.load %arg1[%c0, %c0_0] : memref<8x32xf32, #tpu.memory_space<vmem>>, vector<8x32xf32>
    %c0_1 = arith.constant 0 : index
    %c0_2 = arith.constant 0 : index
    %1 = vector.load %arg2[%c0_1, %c0_2] : memref<5x32xf32, #tpu.memory_space<vmem>>, vector<5x32xf32>
    %cst = arith.constant dense<0.000000e+00> : vector<5x8xf32>
    %2 = tpu.matmul %1, %0, %cst {dimension_numbers = #tpu.dot_dimension_numbers<[1], [1], [0], [0], [0, 0, 1, 0], [], []>} : vector<5x32xf32>, vector<8x32xf32>, vector<5x8xf32> -> vector<5x8xf32>
    %c0_3 = arith.constant 0 : index
    %c0_4 = arith.constant 0 : index
    %3 = vector.load %arg3[%c0_3, %c0_4] : memref<5x1xf32, #tpu.memory_space<vmem>>, vector<5x1xf32>
    %4 = vector.broadcast %3 : vector<5x1xf32> to vector<5x8xf32>
    %5 = arith.addf %2, %4 : vector<5x8xf32>
    %cst_5 = arith.constant 0.000000e+00 : f32
    %6 = vector.broadcast %cst_5 : f32 to vector<5x8xf32>
    %7 = arith.maximumf %5, %6 : vector<5x8xf32>
    %c0_6 = arith.constant 0 : index
    %c0_7 = arith.constant 0 : index
    %8 = vector.load %arg4[%c0_6, %c0_7] : memref<5x5xf32, #tpu.memory_space<vmem>>, vector<5x5xf32>
    %cst_8 = arith.constant dense<0.000000e+00> : vector<5x8xf32>
    %9 = tpu.matmul %8, %7, %cst_8 {dimension_numbers = #tpu.dot_dimension_numbers<[1], [0], [0], [1], [0, 0, 1, 1], [], []>} : vector<5x5xf32>, vector<5x8xf32>, vector<5x8xf32> -> vector<5x8xf32>
    %c0_9 = arith.constant 0 : index
    %c0_10 = arith.constant 0 : index
    %10 = vector.load %arg5[%c0_9, %c0_10] : memref<5x1xf32, #tpu.memory_space<vmem>>, vector<5x1xf32>
    %11 = vector.broadcast %10 : vector<5x1xf32> to vector<5x8xf32>
    %12 = arith.addf %9, %11 : vector<5x8xf32>
    %cst_11 = arith.constant 0.000000e+00 : f32
    %13 = vector.broadcast %cst_11 : f32 to vector<5x8xf32>
    %14 = arith.maximumf %12, %13 : vector<5x8xf32>
    %c0_12 = arith.constant 0 : index
    %c0_13 = arith.constant 0 : index
    %15 = vector.load %arg6[%c0_12, %c0_13] : memref<3x5xf32, #tpu.memory_space<vmem>>, vector<3x5xf32>
    %cst_14 = arith.constant dense<0.000000e+00> : vector<3x8xf32>
    %16 = tpu.matmul %15, %14, %cst_14 {dimension_numbers = #tpu.dot_dimension_numbers<[1], [0], [0], [1], [0, 0, 1, 1], [], []>} : vector<3x5xf32>, vector<5x8xf32>, vector<3x8xf32> -> vector<3x8xf32>
    %c0_15 = arith.constant 0 : index
    %c0_16 = arith.constant 0 : index
    %17 = vector.load %arg7[%c0_15, %c0_16] : memref<3x1xf32, #tpu.memory_space<vmem>>, vector<3x1xf32>
    %18 = vector.broadcast %17 : vector<3x1xf32> to vector<3x8xf32>
    %19 = arith.addf %16, %18 : vector<3x8xf32>
    %c0_17 = arith.constant 0 : index
    %c0_18 = arith.constant 0 : index
    %20 = vector.load %arg8[%c0_17, %c0_18] : memref<3x8xf32, #tpu.memory_space<vmem>>, vector<3x8xf32>
    tpu.vector_store %arg8[%c0_17, %c0_18], %19 {strides = array<i32>} : memref<3x8xf32, #tpu.memory_space<vmem>>, vector<3x8xf32>,
    return
  }
  func.func @transform_0(%arg0: i32) -> (i32, i32) {
    %c0_i32 = arith.constant 0 : i32
    %c0_i32_0 = arith.constant 0 : i32
    return %arg0, %c0_i32 : i32, i32
  }
  func.func @transform_1(%arg0: i32) -> (i32, i32) {
    %c0_i32 = arith.constant 0 : i32
    %c0_i32_0 = arith.constant 0 : i32
    %c0_i32_1 = arith.constant 0 : i32
    return %c0_i32, %c0_i32_0 : i32, i32
  }
  func.func @transform_2(%arg0: i32) -> (i32, i32) {
    %c0_i32 = arith.constant 0 : i32
    %c0_i32_0 = arith.constant 0 : i32
    %c0_i32_1 = arith.constant 0 : i32
    return %c0_i32, %c0_i32_0 : i32, i32
  }
  func.func @transform_3(%arg0: i32) -> (i32, i32) {
    %c0_i32 = arith.constant 0 : i32
    %c0_i32_0 = arith.constant 0 : i32
    %c0_i32_1 = arith.constant 0 : i32
    return %c0_i32, %c0_i32_0 : i32, i32
  }
  func.func @transform_4(%arg0: i32) -> (i32, i32) {
    %c0_i32 = arith.constant 0 : i32
    %c0_i32_0 = arith.constant 0 : i32
    %c0_i32_1 = arith.constant 0 : i32
    return %c0_i32, %c0_i32_0 : i32, i32
  }
  func.func @transform_5(%arg0: i32) -> (i32, i32) {
    %c0_i32 = arith.constant 0 : i32
    %c0_i32_0 = arith.constant 0 : i32
    %c0_i32_1 = arith.constant 0 : i32
    return %c0_i32, %c0_i32_0 : i32, i32
  }
  func.func @transform_6(%arg0: i32) -> (i32, i32) {
    %c0_i32 = arith.constant 0 : i32
    %c0_i32_0 = arith.constant 0 : i32
    %c0_i32_1 = arith.constant 0 : i32
    return %c0_i32, %c0_i32_0 : i32, i32
  }
  func.func @transform_7(%arg0: i32) -> (i32, i32) {
    %c0_i32 = arith.constant 0 : i32
    %c0_i32_0 = arith.constant 0 : i32
    return %c0_i32, %arg0 : i32, i32
  }
}

</mosaic_0001>

<bundles_post_ra>
// kernel: tpu_custom_call.1
= control target key start
LH: loop header
LB: loop body
LE: loop exit
PB: predicated region body
PF: predicated region fallthrough
CT: control target
= control target key end

     0   :  { %vm35_vm0 = vcmask 261120   ;;  %v353_v1 = vmov 0.0   ;;  %vm354_vm1 = vmmov 0   ;;  %v355_v4 = vmov 0   ;;  %s428_s0 = inlined_call_operand.vmem [shape: f32[8,32], index: 0, kind: input, shape index: {}]   ;;  %s429_s1 = inlined_call_operand.vmem [shape: f32[5,32], index: 1, kind: input, shape index: {}]   ;;  %s430_s2 = inlined_call_operand.vmem [shape: f32[5,1], index: 2, kind: input, shape index: {}]   ;;  %s431_s3 = inlined_call_operand.vmem [shape: f32[5,5], index: 3, kind: input, shape index: {}]   ;;  %s432_s4 = inlined_call_operand.vmem [shape: f32[5,1], index: 4, kind: input, shape index: {}]   ;;  %s433_s5 = inlined_call_operand.vmem [shape: f32[3,5], index: 5, kind: input, shape index: {}]   ;;  %s434_s6 = inlined_call_operand.vmem [shape: f32[3,1], index: 6, kind: input, shape index: {}]   ;;  %s435_s7 = inlined_call_operand.hbm [shape: f32[3,8], index: 7, kind: output, shape index: {}]  }
   0x1   :  { %v27_v0 = vld [vmem:[%s428_s0] sm:$0xff]  ;;  %310 = vmatprep.subr.mxu0 %v353_v1  ;;  %312 = vmatprep.mubr.msk.f32.mxu0 %vm354_vm1, %v353_v1 }
   0x2   :  { %v29_v2 = vld [vmem:[%s430_s2] sm:$0x1f]  ;;  %311 = vmatpush3.xpose.msk.msra.mxu0 %vm35_vm0, %v27_v0  ;;  %329 = vset.pattern.permute.xlu0 %v355_v4 }
   0x3   :  { %v28_v3 = vld [vmem:[%s429_s1] sm:$0x1f] }
   0x4   :  { %12 = vsyncpa [#allocation3], 0  ;;  %32 = vperm.xlu0 %329, %v29_v2   ;;  %315 = vmatprep.subr.mxu1 %v353_v1  ;;  %v114_v5 = vld [vmem:[%s432_s4] sm:$0x1f]  ;;  %vm124_vm2 = vcmask 1044480   ;;  %vm120_vm3 = vcmask 39936  }
   0x5   :  { %317 = vmatprep.mubr.msk.f32.mxu1 %vm354_vm1, %v353_v1  ;;  %330 = vset.pattern.permute.xlu1 %v355_v4  ;;  %v113_v11 = vld [vmem:[%s431_s3] sm:$0x1f]  ;;  %s356_s3 = smov [#allocation2]   ;;  %vm282_vm4 = vcmask 59392  }
   0x6   :  { %313 = vmatmul.mubr.msk.f32.vlgmr.msra.gmra.mxu0 %vm35_vm0, %v28_v3  ;;  %v200_v12 = vld [vmem:[%s434_s6] sm:$0x7]  ;;  %s290_s11 = sshll.u32 %s356_s3, 4  ;;  %s291_s11 = int_to_ptr.vmem [resolvable:$true] %s290_s11 }
   0x7   :  { %203 = vperm.xlu1 %330, %v200_v12   ;;  %v199_v18 = vld [vmem:[%s433_s5] sm:$0x7]  ;;  %s331_s6 = scalar_lea.vmem %s291_s11, 64  ;;  %p336_p1 = scmp.lt.s32.totalorder %s291_s11, %s291_s11 }
   0x8   :  { %117 = vperm.xlu0 %329, %v114_v5   ;;  %p332_p0 = scmp.ne.s32.totalorder %s291_s11, %s331_s6  ;;  %p337_p2 = scmp.lt.s32.totalorder %s331_s6, %s331_s6 }
   0xa   :  { %p338_p3 = por %p337_p2, %p336_p1 }
   0xc   :  { %p339_p4 = pnand %p338_p3, %p332_p0 }
  0x7f   :  { %v33_v6 = vpop.permute.xlu0 %32 }
  0x82   :  { %v204_v19 = vpop.permute.xlu1 %203 }
  0x83   :  { %v118_v13 = vpop.permute.xlu0 %117 }
  0xc6   :  { %v108_v7 = vpop.f32.mrf.mxu0 }
  0xc7   :  { %v109_v8 = vadd.f32 %v108_v7, %v33_v6 }
  0xc8   :  { %v314_v9 = vpop.f32.mrf.mxu0 }
  0xc9   :  { %v112_v10 = vmax.f32 %v109_v8, 0.0 }
  0xcb   :  { %316 = vmatpush3.msk.msra.mxu1 %vm124_vm2, %v112_v10 }
  0xcc   :  { %318 = vmatmul.mubr.msk.f32.vlgmr.msra.gmra.mxu1 %vm120_vm3, %v113_v11  ;;  %320 = vmatprep.subr.mxu1 %v353_v1 }
  0xcd   :  { %322 = vmatprep.mubr.msk.f32.mxu1 %vm354_vm1, %v353_v1 }
 0x18c   :  { %v194_v14 = vpop.f32.mrf.mxu1 }
 0x18d   :  { %v195_v15 = vadd.f32 %v194_v14, %v118_v13 }
 0x18e   :  { %v319_v16 = vpop.f32.mrf.mxu1 }
 0x18f   :  { %v198_v17 = vmax.f32 %v195_v15, 0.0 }
 0x191   :  { %321 = vmatpush3.msk.msra.mxu1 %vm124_vm2, %v198_v17 }
 0x192   :  { %323 = vmatmul.mubr.msk.f32.vlgmr.msra.gmra.mxu1 %vm120_vm3, %v199_v18 }
 0x252   :  { %v278_v20 = vpop.f32.mrf.mxu1 }
 0x253   :  { %v279_v21 = vadd.f32 %v278_v20, %v204_v19 }
 0x254   :  { %v324_v22 = vpop.f32.mrf.mxu1 }
 0x255   :  { %283 = vst.msk [vmem:[#allocation2] sm:$0x7] %vm282_vm4, %v279_v21 }
 0x256   :  { %342 = shalt.err (!%p339_p4)
}
 0x257   :  { %293 = dma.vmem_to_hbm [thread:$0]  %s291_s11, 64, %s435_s7, [#allocation3]  }
 0x258   :  { %351 = dma.done.wait [#allocation3], 64  }
 0x259   :  { %352 = vsyncadd [#allocation3], 4294967232 }
 0x25a   :  { %297 = vsyncpa [#allocation3], 1 }

</bundles_post_ra>
